<compile_context>
chip_gen: v5e
topology: v5e:2x2
jax: 0.10.0
libtpu: 0.0.40
codegen_flags: <defaults>
</compile_context>

<pallas_src>
import jax
import jax.numpy as jnp
from jax.experimental import pallas as pl
from jax.experimental.pallas import tpu as pltpu


def _fused_atentie_kernel(x_ref, w_ref, b_ref, o_ref):
    # x:     (bt, S, D)   native dtype
    # w:     (3, D, D)    native dtype, pre-transposed (x @ w[i] = Linear_i(x)),
    #                     1/sqrt(D) folded into w[0]
    # b:     (3, 1, D)    float32, 1/sqrt(D) folded into b[0]
    # o:     (bt, S, D)
    bt, S, D = x_ref.shape
    dt = x_ref.dtype

    x2 = x_ref[...].reshape(bt * S, D)              # flatten rows -> one big-M matmul

    # Q/K/V projections.  Leading-axis indexing of w/b (no lane-offset column
    # slices).  f32 accumulation, cast back to native dtype for the MXU ops.
    q = (jnp.dot(x2, w_ref[0], preferred_element_type=jnp.float32)
         + b_ref[0]).astype(dt).reshape(bt, S, D)
    k = (jnp.dot(x2, w_ref[1], preferred_element_type=jnp.float32)
         + b_ref[1]).astype(dt).reshape(bt, S, D)
    v = (jnp.dot(x2, w_ref[2], preferred_element_type=jnp.float32)
         + b_ref[2]).astype(dt).reshape(bt, S, D)

    # scores = (q @ k^T) / sqrt(D); the scale is already folded into q.
    scores = jnp.einsum("bqd,bkd->bqk", q, k,
                        preferred_element_type=jnp.float32)        # (bt, S, S) f32

    # Numerically stable softmax (f32, exact division -> parity with reference).
    m = jnp.max(scores, axis=-1, keepdims=True)
    e = jnp.exp(scores - m)
    denom = jnp.sum(e, axis=-1, keepdims=True)
    attn = (e / denom).astype(dt)

    out = jnp.einsum("bqk,bkd->bqd", attn, v,
                     preferred_element_type=jnp.float32)           # (bt, S, D)
    o_ref[...] = out.astype(o_ref.dtype)


def _pick_batch_tile(B, S, D, itemsize, budget_bytes=12 * 1024 * 1024):
    """Batches per grid step: amortize ~0.35us/step overhead, keep VMEM small,
    keep bt | B and (when B >= 2) at least 2 grid steps for megacore sharding."""
    per_b = (2 * 2 * S * D * itemsize        # x / out tiles, double-buffered
             + 3 * S * D * 4                 # q, k, v
             + 2 * S * S * 4)                # scores + exp (f32)
    bt = max(1, min(B, budget_bytes // max(per_b, 1)))
    while bt > 1 and (B % bt != 0 or B // bt < 2):
        bt -= 1
    return bt


def atentie_forward(strat, wq, bq, wk, bk, wv, bv):
    """Pallas forward for Atentie. strat: (B, S, D); W*: (D, D); b*: (D,)."""
    B, S, D = strat.shape
    scale = 1.0 / (float(D) ** 0.5)

    # nn.Linear: y = x @ W^T + b.  Pre-transpose, fold the attention scale into
    # the Q projection, stack on a leading axis for free in-kernel indexing.
    w_qkv = jnp.stack([wq.T * scale, wk.T, wv.T], axis=0).astype(strat.dtype)   # (3, D, D)
    b_qkv = jnp.stack([bq * scale, bk, bv], axis=0).astype(
        jnp.float32).reshape(3, 1, D)                                           # (3, 1, D)

    bt = _pick_batch_tile(B, S, D, jnp.dtype(strat.dtype).itemsize)
    grid = (B // bt,)

    out = pl.pallas_call(
        _fused_atentie_kernel,
        out_shape=jax.ShapeDtypeStruct((B, S, D), strat.dtype),
        grid_spec=pltpu.PrefetchScalarGridSpec(
            num_scalar_prefetch=0,
            grid=grid,
            in_specs=[
                pl.BlockSpec((bt, S, D), lambda b: (b, 0, 0)),   # batch tile of x
                pl.BlockSpec((3, D, D), lambda b: (0, 0, 0)),    # resident weights
                pl.BlockSpec((3, 1, D), lambda b: (0, 0, 0)),    # resident biases
            ],
            out_specs=pl.BlockSpec((bt, S, D), lambda b: (b, 0, 0)),
        ),
        compiler_params=pltpu.CompilerParams(
            dimension_semantics=("parallel",)),
    )(strat, w_qkv, b_qkv)
    return out


def atentie_reference(strat, wq, bq, wk, bk, wv, bv):
    D = strat.shape[-1]
    q = strat @ wq.T + bq
    k = strat @ wk.T + bk
    v = strat @ wv.T + bv
    scores = jnp.einsum("bqd,bkd->bqk", q, k) / (D ** 0.5)
    attn = jax.nn.softmax(scores, axis=-1)
    return jnp.einsum("bqk,bkd->bqd", attn, v)


if __name__ == "__main__":
    B, S, D = 2, 8, 32  # batch, sequence length, dim_embedding

    key = jax.random.PRNGKey(0)
    k_x, k_wq, k_bq, k_wk, k_bk, k_wv, k_bv = jax.random.split(key, 7)

    strat = jax.random.normal(k_x, (B, S, D), dtype=jnp.float32)

    # deterministic param init mimicking nn.Linear's uniform(-1/sqrt(D), 1/sqrt(D))
    bound = 1.0 / (D ** 0.5)
    wq = jax.random.uniform(k_wq, (D, D), jnp.float32, -bound, bound)
    bq = jax.random.uniform(k_bq, (D,), jnp.float32, -bound, bound)
    wk = jax.random.uniform(k_wk, (D, D), jnp.float32, -bound, bound)
    bk = jax.random.uniform(k_bk, (D,), jnp.float32, -bound, bound)
    wv = jax.random.uniform(k_wv, (D, D), jnp.float32, -bound, bound)
    bv = jax.random.uniform(k_bv, (D,), jnp.float32, -bound, bound)

    out = atentie_forward(strat, wq, bq, wk, bk, wv, bv)
    out = jax.block_until_ready(out)

    ref = atentie_reference(strat, wq, bq, wk, bk, wv, bv)
    assert out.shape == (B, S, D), out.shape
    assert jnp.allclose(out, ref, atol=1e-3, rtol=1e-3), float(
        jnp.max(jnp.abs(out - ref)))

    print("KERNEL_OK")
</pallas_src>

<mosaic_0001>
module attributes {stable_mosaic.version = 11 : i64} {
  func.func @_fused_atentie_kernel(%arg0: i32, %arg1: memref<1x8x32xf32, #tpu.memory_space<vmem>>, %arg2: memref<3x32x32xf32, #tpu.memory_space<vmem>>, %arg3: memref<3x1x32xf32, #tpu.memory_space<vmem>>, %arg4: memref<1x8x32xf32, #tpu.memory_space<vmem>>) attributes {dimension_semantics = [#tpu.dimension_semantics<parallel>], iteration_bounds = array<i64: 2>, scalar_prefetch = 0 : i64, scratch_operands = 0 : i64, tpu.core_type = #tpu.core_type<tc>, window_params = [{transform_indices = @transform_0, window_bounds = array<i64: 1, 8, 32>}, {pipeline_mode = #tpu.pipeline_mode<synchronous>, transform_indices = @transform_1, window_bounds = array<i64: 3, 32, 32>}, {pipeline_mode = #tpu.pipeline_mode<synchronous>, transform_indices = @transform_2, window_bounds = array<i64: 3, 1, 32>}, {transform_indices = @transform_3, window_bounds = array<i64: 1, 8, 32>}]} {
    %c0 = arith.constant 0 : index
    %c0_0 = arith.constant 0 : index
    %c0_1 = arith.constant 0 : index
    %0 = vector.load %arg1[%c0, %c0_0, %c0_1] : memref<1x8x32xf32, #tpu.memory_space<vmem>>, vector<1x8x32xf32>
    %1 = vector.shape_cast %0 : vector<1x8x32xf32> to vector<8x32xf32>
    %c0_2 = arith.constant 0 : index
    %c0_3 = arith.constant 0 : index
    %c0_4 = arith.constant 0 : index
    %2 = vector.load %arg2[%c0_2, %c0_3, %c0_4] : memref<3x32x32xf32, #tpu.memory_space<vmem>>, vector<1x32x32xf32>
    %3 = vector.shape_cast %2 : vector<1x32x32xf32> to vector<32x32xf32>
    %cst = arith.constant dense<0.000000e+00> : vector<8x32xf32>
    %4 = tpu.matmul %1, %3, %cst {dimension_numbers = #tpu.dot_dimension_numbers<[1], [0], [0], [1], [0, 0, 1, 1], [], []>} : vector<8x32xf32>, vector<32x32xf32>, vector<8x32xf32> -> vector<8x32xf32>
    %c0_5 = arith.constant 0 : index
    %c0_6 = arith.constant 0 : index
    %c0_7 = arith.constant 0 : index
    %5 = vector.load %arg3[%c0_5, %c0_6, %c0_7] : memref<3x1x32xf32, #tpu.memory_space<vmem>>, vector<1x1x32xf32>
    %6 = vector.shape_cast %5 : vector<1x1x32xf32> to vector<1x32xf32>
    %7 = vector.broadcast %6 : vector<1x32xf32> to vector<8x32xf32>
    %8 = arith.addf %4, %7 : vector<8x32xf32>
    %9 = vector.shape_cast %8 : vector<8x32xf32> to vector<1x8x32xf32>
    %c1 = arith.constant 1 : index
    %c0_8 = arith.constant 0 : index
    %c0_9 = arith.constant 0 : index
    %10 = vector.load %arg2[%c1, %c0_8, %c0_9] : memref<3x32x32xf32, #tpu.memory_space<vmem>>, vector<1x32x32xf32>
    %11 = vector.shape_cast %10 : vector<1x32x32xf32> to vector<32x32xf32>
    %cst_10 = arith.constant dense<0.000000e+00> : vector<8x32xf32>
    %12 = tpu.matmul %1, %11, %cst_10 {dimension_numbers = #tpu.dot_dimension_numbers<[1], [0], [0], [1], [0, 0, 1, 1], [], []>} : vector<8x32xf32>, vector<32x32xf32>, vector<8x32xf32> -> vector<8x32xf32>
    %c1_11 = arith.constant 1 : index
    %c0_12 = arith.constant 0 : index
    %c0_13 = arith.constant 0 : index
    %13 = vector.load %arg3[%c1_11, %c0_12, %c0_13] : memref<3x1x32xf32, #tpu.memory_space<vmem>>, vector<1x1x32xf32>
    %14 = vector.shape_cast %13 : vector<1x1x32xf32> to vector<1x32xf32>
    %15 = vector.broadcast %14 : vector<1x32xf32> to vector<8x32xf32>
    %16 = arith.addf %12, %15 : vector<8x32xf32>
    %17 = vector.shape_cast %16 : vector<8x32xf32> to vector<1x8x32xf32>
    %c2 = arith.constant 2 : index
    %c0_14 = arith.constant 0 : index
    %c0_15 = arith.constant 0 : index
    %18 = vector.load %arg2[%c2, %c0_14, %c0_15] : memref<3x32x32xf32, #tpu.memory_space<vmem>>, vector<1x32x32xf32>
    %19 = vector.shape_cast %18 : vector<1x32x32xf32> to vector<32x32xf32>
    %cst_16 = arith.constant dense<0.000000e+00> : vector<8x32xf32>
    %20 = tpu.matmul %1, %19, %cst_16 {dimension_numbers = #tpu.dot_dimension_numbers<[1], [0], [0], [1], [0, 0, 1, 1], [], []>} : vector<8x32xf32>, vector<32x32xf32>, vector<8x32xf32> -> vector<8x32xf32>
    %c2_17 = arith.constant 2 : index
    %c0_18 = arith.constant 0 : index
    %c0_19 = arith.constant 0 : index
    %21 = vector.load %arg3[%c2_17, %c0_18, %c0_19] : memref<3x1x32xf32, #tpu.memory_space<vmem>>, vector<1x1x32xf32>
    %22 = vector.shape_cast %21 : vector<1x1x32xf32> to vector<1x32xf32>
    %23 = vector.broadcast %22 : vector<1x32xf32> to vector<8x32xf32>
    %24 = arith.addf %20, %23 : vector<8x32xf32>
    %25 = vector.shape_cast %24 : vector<8x32xf32> to vector<1x8x32xf32>
    "tpu.trace_start"() <{level = 10 : i32, message = "bqd,bkd->bqk"}> : () -> ()
    %cst_20 = arith.constant dense<0.000000e+00> : vector<1x8x8xf32>
    %26 = tpu.matmul %9, %17, %cst_20 {dimension_numbers = #tpu.dot_dimension_numbers<[2], [2], [1], [1], [0, 0, 0, 1, 1, 1], [0], [0]>} : vector<1x8x32xf32>, vector<1x8x32xf32>, vector<1x8x8xf32> -> vector<1x8x8xf32>
    "tpu.trace_stop"() : () -> ()
    %cst_21 = arith.constant dense<0xFF800000> : vector<1x8xf32>
    %27 = vector.multi_reduction <maximumf>, %26, %cst_21 [2] : vector<1x8x8xf32> to vector<1x8xf32>
    %28 = vector.shape_cast %27 : vector<1x8xf32> to vector<1x8x1xf32>
    %29 = vector.broadcast %28 : vector<1x8x1xf32> to vector<1x8x8xf32>
    %30 = arith.subf %26, %29 : vector<1x8x8xf32>
    %31 = math.exp %30 : vector<1x8x8xf32>
    %cst_22 = arith.constant dense<0.000000e+00> : vector<1x8xf32>
    %32 = vector.multi_reduction <add>, %31, %cst_22 [2] : vector<1x8x8xf32> to vector<1x8xf32>
    %33 = vector.shape_cast %32 : vector<1x8xf32> to vector<1x8x1xf32>
    %34 = vector.broadcast %33 : vector<1x8x1xf32> to vector<1x8x8xf32>
    %35 = arith.divf %31, %34 : vector<1x8x8xf32>
    "tpu.trace_start"() <{level = 10 : i32, message = "bqk,bkd->bqd"}> : () -> ()
    %cst_23 = arith.constant dense<0.000000e+00> : vector<1x8x32xf32>
    %36 = tpu.matmul %35, %25, %cst_23 {dimension_numbers = #tpu.dot_dimension_numbers<[2], [1], [1], [2], [0, 0, 0, 1, 1, 2], [0], [0]>} : vector<1x8x8xf32>, vector<1x8x32xf32>, vector<1x8x32xf32> -> vector<1x8x32xf32>
    "tpu.trace_stop"() : () -> ()
    %c0_24 = arith.constant 0 : index
    %c0_25 = arith.constant 0 : index
    %c0_26 = arith.constant 0 : index
    %37 = vector.load %arg4[%c0_24, %c0_25, %c0_26] : memref<1x8x32xf32, #tpu.memory_space<vmem>>, vector<1x8x32xf32>
    tpu.vector_store %arg4[%c0_24, %c0_25, %c0_26], %36 {strides = array<i32>} : memref<1x8x32xf32, #tpu.memory_space<vmem>>, vector<1x8x32xf32>,
    return
  }
  func.func @transform_0(%arg0: i32) -> (i32, i32, i32) {
    %c0_i32 = arith.constant 0 : i32
    %c0_i32_0 = arith.constant 0 : i32
    %c0_i32_1 = arith.constant 0 : i32
    return %arg0, %c0_i32, %c0_i32_0 : i32, i32, i32
  }
  func.func @transform_1(%arg0: i32) -> (i32, i32, i32) {
    %c0_i32 = arith.constant 0 : i32
    %c0_i32_0 = arith.constant 0 : i32
    %c0_i32_1 = arith.constant 0 : i32
    %c0_i32_2 = arith.constant 0 : i32
    return %c0_i32, %c0_i32_0, %c0_i32_1 : i32, i32, i32
  }
  func.func @transform_2(%arg0: i32) -> (i32, i32, i32) {
    %c0_i32 = arith.constant 0 : i32
    %c0_i32_0 = arith.constant 0 : i32
    %c0_i32_1 = arith.constant 0 : i32
    %c0_i32_2 = arith.constant 0 : i32
    return %c0_i32, %c0_i32_0, %c0_i32_1 : i32, i32, i32
  }
  func.func @transform_3(%arg0: i32) -> (i32, i32, i32) {
    %c0_i32 = arith.constant 0 : i32
    %c0_i32_0 = arith.constant 0 : i32
    %c0_i32_1 = arith.constant 0 : i32
    return %arg0, %c0_i32, %c0_i32_0 : i32, i32, i32
  }
}

</mosaic_0001>

<bundles_post_ra>
// kernel: tpu_custom_call.1
= control target key start
LH: loop header
LB: loop body
LE: loop exit
PB: predicated region body
PF: predicated region fallthrough
CT: control target
= control target key end

     0   :  { %8 = vsyncpa [#allocation3], 0  ;;  %s940_s0 = inlined_call_operand.hbm [shape: f32[2,8,32], index: 0, kind: input, shape index: {}]   ;;  %s941_s1 = inlined_call_operand.hbm [shape: f32[3,32,32], index: 1, kind: input, shape index: {}]   ;;  %s942_s2 = inlined_call_operand.hbm [shape: f32[3,1,32], index: 2, kind: input, shape index: {}]   ;;  %s943_s3 = inlined_call_operand.hbm [shape: f32[2,8,32], index: 3, kind: output, shape index: {}]  }
   0x1   :  { %10 = vsyncpa [#allocation3 + $0x1], 0 }
   0x2   :  { %11 = vsyncpa [#allocation6], 0 }
   0x3   :  { %12 = vsyncpa [#allocation4], 0 }
   0x4   :  { %14 = vsyncpa [#allocation4 + $0x1], 0  ;;  %s782_s12 = smov 0   ;;  %s784_s13 = smov 0  }
   0x5   :  { %s786_s14 = smov 0   ;;  %s788_s15 = smov 0  }
   0x6 LB: > { %s130_s18 = sshll.u32 %s941_s1, 4  ;;  %s806_s19 = sadd.s32 4294967295, %s754_s15   ;;  %s754_s15 = sphi %s788_s15, %s954_s15   ;;  %s750_s14 = sphi %s786_s14, %s953_s14   ;;  %s746_s13 = sphi %s784_s13, %s952_s13   ;;  %s742_s12 = sphi %s782_s12, %s951_s12   ;;  %s131_s18 = int_to_ptr.hbm [resolvable:$true] %s130_s18 }
   0x7   : > { %p495_p0 = scmp.ge.s32.totalorder %s754_s15, 1  ;;  %p41_p1 = scmp.eq.s32.totalorder %s806_s19, 0 }
   0x8   : > { %p119_p2 = scmp.lt.s32.totalorder %s754_s15, 3  ;;  %s756_s21 = smov [#allocation5]  }
   0x9   : > { %s132_s22 = sshll.u32 %s756_s21, 4  ;;  %s144_s25 = sshll.u32 %s942_s2, 4  ;;  %s133_s22 = int_to_ptr.vmem [resolvable:$true] %s132_s22  ;;  %s145_s25 = int_to_ptr.hbm [resolvable:$true] %s144_s25 }
   0xa   : > { %p811_p3 = pnand %p495_p0, %p119_p2  ;;  %s757_s26 = smov [#allocation7]  }
   0xb   : > { %s146_s27 = sshll.u32 %s757_s26, 4  ;;  %s758_s28 = smov 128   ;;  %s147_s27 = int_to_ptr.vmem [resolvable:$true] %s146_s27 }
   0xc   : > { %p528_p4 = pneg %p811_p3  ;;  %s759_s29 = smov 8  }
   0xd   : > { %s760_s30 = smov 16   ;;  %s761_s4 = smov 1  }
   0xe   : > { %p529_p6 = pnand %p528_p4, %p41_p1  ;;  %s494_s5 = sadd.s32 4294967294, %s754_s15  }
   0xf   : > { %s825_s6 = sadd.s32 1, %s754_s15   ;;  %s27_s8 = sadd.s32 1, %s750_s14 }
  0x10   : > { %531 = dma.hbm_to_vmem [thread:$0]  (!%p529_p6), %s131_s18, 1536, %s133_s22, [#allocation6], %s758_s28, %s758_s28, %s759_s29  }
  0x11   : > { %534 = dma.hbm_to_vmem [thread:$0]  (!%p529_p6), %s145_s25, 48, %s147_s27, [#allocation6], %s760_s30, %s760_s30, %s761_s4  }
  0x12   : > { %s24_s7 = ssub.s32 %s754_s15, %s825_s6  ;;  %p34_p8 = scmp.ne.s32.totalorder %s750_s14, %s746_s13 }
  0x13   : > { %p25_p7 = scmp.eq.s32.totalorder %s24_s7, 0  ;;  %p35_p9 = scmp.eq.s32.totalorder %s754_s15, 0 }
  0x14   : > { %p40_p10 = scmp.ne.s32.totalorder %s746_s13, %s742_s12  ;;  %p106_p13 = scmp.eq.s32.totalorder %s806_s19, 1 }
  0x15   : > { %s836_s9 = scalar_select %p25_p7, %s750_s14, %s27_s8  }
  0x16   : > { %p838_p11 = por %p35_p9, %p34_p8  ;;  %p844_p12 = por %p41_p1, %p40_p10 }
  0x17   : > { %p112_p0 = scmp.eq.s32.totalorder %s494_s5, 1  ;;  %p545_p2 = scmp.lt.s32.totalorder %s754_s15, 2 }
  0x18   : > { %s160_s16 = sand.u32 1, %s750_s14   ;;  %p851_p4 = por %p106_p13, %p34_p8 }
  0x19   : > { %p855_p6 = por %p112_p0, %p40_p10  ;;  %s499_s21 = sshll.u32 %s160_s16, 3 }
  0x1a   : > { %s500_s22 = sshll.u32 %s754_s15, 3  ;;  %s164_s26 = scalar_lea.vmem [#allocation2], %s499_s21 }
  0x1b   : > { %s168_s25 = scalar_lea.hbm %s940_s0, %s500_s22  ;;  %s172_s27 = sshll.u32 %s164_s26, 4  ;;  %s173_s27 = int_to_ptr.vmem [resolvable:$true] %s172_s27 }
  0x1c   : > { %s170_s28 = sshll.u32 %s168_s25, 4  ;;  %p865_p7 = pnand %p545_p2, %p838_p11  ;;  %s171_s28 = int_to_ptr.hbm [resolvable:$true] %s170_s28 }
  0x1d   : > { %s161_s30 = scalar_lea.sflag [#allocation3], %s160_s16  ;;  %s654_s4 = sshra.s32 %s171_s28, 4  ;;  %s655_s4 = int_to_ptr.hbm [resolvable:$true] %s654_s4 }
  0x1e   : > { %s656_s5 = scalar_lea.hbm %s655_s4, 8  ;;  %p658_p9 = pneg %p865_p7 }
  0x1f   : > { %p657_p8 = scmp.ne.s32.totalorder %s655_s4, %s656_s5  ;;  %s661_s21 = scalar_lea.hbm %s940_s0, 16 }
  0x20   : > { %p662_p11 = scmp.lt.s32.totalorder %s655_s4, %s940_s0  ;;  %p663_p0 = scmp.lt.s32.totalorder %s661_s21, %s656_s5 }
  0x21   : > { %p659_p10 = pnand %p658_p9, %p657_p8 }
  0x22   : > { %p664_p2 = por %p663_p0, %p662_p11 }
  0x23   : > { %p660_p13 = pneg %p659_p10 }
  0x25   : > { %p665_p5 = pnand %p664_p2, %p660_p13 }
  0x27   : > { %668 = shalt.err (!%p665_p5)
}
  0x28   : > { %538 = dma.hbm_to_vmem [thread:$0]  (!%p865_p7), %s171_s28, 128, %s173_s27, %s161_s30  }
  0x29   : > { %181 = sbr.rel (%p811_p3) target bundleno = 719 (0x2cf), region = 32  ;;  %s882_s16 = sand.u32 (!%p811_p3), 1, %s746_s13  }
  0x2a   : > { %s502_s23 = sshll.u32 (!%p811_p3), %s882_s16, 3  ;;  %s184_s24 = scalar_lea.sflag (!%p811_p3), [#allocation3], %s882_s16 }
  0x2b   : > { %s187_s25 = scalar_lea.vmem (!%p811_p3), [#allocation2], %s502_s23 }
  0x2e   : > { %729 = dma.done.wait (%p844_p12), %s184_s24, 128  }
  0x2f   : > { %731 = vsyncadd (%p844_p12), %s184_s24, 4294967168 }
  0x30   : > { %733 = dma.done.wait (%p41_p1), [#allocation6], 1584  }
  0x31   : > { %735 = vsyncadd (%p41_p1), [#allocation6], 4294965712  ;;  %v258_v0 = vld [vmem:[#allocation5 + $0x38] sm:$0xff]  ;;  %v257_v1 = vld [vmem:[#allocation5 + $0x30] sm:$0xff]  ;;  %vm230_vm0 = vcmask 261120   ;;  %vm340_vm1 = vcmask 64512  }
  0x32   : > { %v225_v2 = vld [vmem:[#allocation5 + $0x18] sm:$0xff]  ;;  %276 = vmatpush.msra.mxu1 %v258_v0  ;;  %v224_v3 = vld [vmem:[#allocation5 + $0x10] sm:$0xff]  ;;  %v256_v4 = vld [vmem:[#allocation5 + $0x28] sm:$0xff]  ;;  %s513_s20 = sshll.u32 %s806_s19, 3  ;;  %s220_s28 = scalar_lea.vmem [#allocation8], %s502_s23 }
  0x33   : > { %246 = vmatpush.msra.mxu0 %v225_v2  ;;  %v223_v5 = vld [vmem:[#allocation5 + $0x8] sm:$0xff]  ;;  %v255_v6 = vld [vmem:[#allocation5 + $0x20] sm:$0xff]  ;;  %v221_v8 = vld [vmem:[%s187_s25] sm:$0xff]  ;;  %s400_s27 = scalar_lea.hbm %s943_s3, %s513_s20  ;;  %s402_s29 = sshll.u32 %s220_s28, 4  ;;  %s403_s29 = int_to_ptr.vmem [resolvable:$true] %s402_s29 }
  0x34   : > { %277 = vmatpush.msra.mxu1 %v257_v1  ;;  %v222_v7 = vld [vmem:[#allocation5] sm:$0xff]  ;;  %v288_v15 = vld [vmem:[#allocation5 + $0x58] sm:$0xff]  ;;  %v287_v18 = vld [vmem:[#allocation5 + $0x50] sm:$0xff]  ;;  %s404_s30 = sshll.u32 %s400_s27, 4  ;;  %s390_s4 = scalar_lea.sflag [#allocation4], %s882_s16  ;;  %s405_s30 = int_to_ptr.hbm [resolvable:$true] %s404_s30 }
  0x35   : > { %247 = vmatpush.msra.mxu0 %v224_v3  ;;  %v587_v9 = vld [vmem:[#allocation7 + $0x1] ss:$0 sm:$0xff]  ;;  %v588_v10 = vld [vmem:[#allocation7] ss:$0 sm:$0xff]  ;;  %306 = vmatpush.msra.mxu2 %v288_v15  ;;  %v286_v19 = vld [vmem:[#allocation5 + $0x48] sm:$0xff]  ;;  %s698_s5 = sshra.s32 %s405_s30, 4  ;;  %s699_s5 = int_to_ptr.hbm [resolvable:$true] %s698_s5 }
  0x36   : > { %278 = vmatpush.msra.mxu1 %v256_v4  ;;  %v285_v20 = vld [vmem:[#allocation5 + $0x40] sm:$0xff]  ;;  %s700_s7 = scalar_lea.hbm %s699_s5, 8  ;;  %s704_s21 = scalar_lea.hbm %s943_s3, 16 }
  0x37   : > { %248 = vmatpush.msra.mxu0 %v223_v5  ;;  %307 = vmatpush.msra.mxu2 %v287_v18  ;;  %v589_v26 = vld [vmem:[#allocation7 + $0x2] ss:$0 sm:$0xff]  ;;  %p701_p1 = scmp.ne.s32.totalorder %s699_s5, %s700_s7  ;;  %p705_p12 = scmp.lt.s32.totalorder %s699_s5, %s943_s3 }
  0x38   : > { %279 = vmatpush.msra.mxu1 %v255_v6  ;;  %p706_p7 = scmp.lt.s32.totalorder %s704_s21, %s700_s7 }
  0x39   : > { %249 = vmatpush.msra.mxu0 %v222_v7  ;;  %507 = vmatmul.msk.f32.vlgmr.msra.gmra.mxu1 %vm230_vm0, %v221_v8  ;;  %p702_p3 = pnand %p701_p1, %p851_p4 }
  0x3a   : > { %506 = vmatmul.msk.f32.vlgmr.msra.gmra.mxu0 %vm230_vm0, %v221_v8  ;;  %308 = vmatpush.msra.mxu2 %v286_v19  ;;  %p707_p8 = por %p706_p7, %p705_p12 }
  0x3b   : > { %p703_p5 = pneg %p702_p3 }
  0x3c   : > { %309 = vmatpush.msra.mxu2 %v285_v20 }
  0x3d   : > { %508 = vmatmul.msk.f32.vlgmr.msra.gmra.mxu2 %vm230_vm0, %v221_v8  ;;  %p708_p9 = pnand %p707_p8, %p703_p5 }
  0xb6   : > { %v281_v11 = vpop.f32.mrf.mxu1 }
  0xb7   : > { %v251_v12 = vpop.f32.mrf.mxu0  ;;  %v282_v13 = vadd.f32 %v587_v9, %v281_v11 }
  0xb8   : > { %v252_v14 = vadd.f32 %v588_v10, %v251_v12 }
  0xb9   : > { %509 = vmatpush.xpose.msk.msra.mxu3 %vm230_vm0, %v282_v13 }
  0xbc   : > { %510 = vmatmul.msk.f32.vlgmr.msra.gmra.mxu3 %vm230_vm0, %v252_v14 }
  0xc0   : > { %v311_v27 = vpop.f32.mrf.mxu2 }
  0xc1   : > { %v312_v28 = vadd.f32 %v589_v26, %v311_v27 }
  0xc3   : > { %383 = vmatpush.msrb.mxu3 %v312_v28 }
 0x13f   : > { %v337_v16 = vpop.f32.mrf.mxu3 }
 0x140   : > { %v341_v17 = vsel %vm340_vm1, %v337_v16, -inf }
 0x141   : > { %342 = vmax.xlane.f32.xlu0 %v341_v17 }
 0x1b4   : > { %v343_v21 = vpop.xlane.xlu0 %342 }
 0x1b5   : > { %v344_v22 = vsub.f32 %v337_v16, %v343_v21 }
 0x1b7   : > { %v345_v23 = vmul.f32 1.442695, %v344_v22 }
 0x1b9   : > { %590 = vpow2.f32 %v345_v23 }
 0x1bf   : > { %v591_v24 = vpop.eup %590 }
 0x1c0   : > { %v347_v25 = vsel %vm340_vm1, %v591_v24, 0.0 }
 0x1c1   : > { %348 = vadd.xlane.f32.xlu0 %v347_v25 }
 0x234   : > { %v349_v29 = vpop.xlane.xlu0 %348 }
 0x235   : > { %592 = vrcp.f32 %v349_v29  ;;  %v361_v33 = vand.u32 2147483648, %v349_v29  ;;  %v359_v35 = vand.u32 2147483647, %v349_v29  ;;  %vm355_vm3 = vweird.f32 %v349_v29 }
 0x237   : > { %v362_v37 = vor.u32 1.1754944e-38, %v361_v33  ;;  %vm360_vm5 = vcmp.eq.f32.partialorder %v359_v35, 8.507059e+37 }
 0x23b   : > { %v593_v30 = vpop.eup %592 }
 0x23c   : > { %v351_v31 = vmul.f32 %v593_v30, %v349_v29  ;;  %vm356_vm2 = vweird.f32 %v593_v30 }
 0x23d   : > { %vm357_vm4 = vmor %vm355_vm3, %vm356_vm2 }
 0x23e   : > { %v352_v32 = vsub.f32 1.0, %v351_v31 }
 0x240   : > { %v353_v34 = vmul.f32 %v593_v30, %v352_v32 }
 0x242   : > { %v354_v36 = vadd.f32 %v593_v30, %v353_v34 }
 0x244   : > { %v358_v38 = vsel %vm357_vm4, %v593_v30, %v354_v36 }
 0x245   : > { %v363_v39 = vsel %vm360_vm5, %v362_v37, %v358_v38 }
 0x246   : > { %v364_v40 = vmul.f32 %v591_v24, %v363_v39 }
 0x248   : > { %511 = vmatmul.msk.f32.vlgmr.msrb.gmra.mxu3 %vm340_vm1, %v364_v40 }
 0x2cb   : > { %v385_v41 = vpop.f32.mrf.mxu3 }
 0x2cc   : > { %388 = vst.msk [vmem:[%s220_s28] sm:$0xff] %vm230_vm0, %v385_v41 }
 0x2cd   : > { %711 = shalt.err (!%p708_p9)
}
 0x2ce   : > { %526 = dma.vmem_to_hbm [thread:$0]  (%p851_p4), %s403_s29, 128, %s405_s30, %s390_s4  }
 0x2cf PF: > { %s416_s16 = sand.u32 1, %s742_s12   ;;  %p950_p10 = scmp.ge.s32.totalorder %s754_s15, 2 }
 0x2d0   : > { %s417_s23 = scalar_lea.sflag [#allocation4], %s416_s16 }
 0x2d1   : > { %p540_p13 = pnand %p950_p10, %p855_p6 }
 0x2d3   : > { %p541_p11 = pneg %p540_p13 }
 0x2d5   : > { %737 = dma.done.wait (%p541_p11), %s417_s23, 128  }
 0x2d6   : > { %739 = vsyncadd (%p541_p11), %s417_s23, 4294967168  ;;  %p17_p0 = scmp.ge.s32.totalorder %s825_s6, 4   ;;  %s951_s12 = smov %s746_s13 }
 0x2d7   : > { %s952_s13 = smov %s750_s14  ;;  %s953_s14 = smov %s836_s9 }
 0x2d8   : > { %s954_s15 = smov %s825_s6  ;;  %19 = sbr.rel (!%p17_p0) target bundleno = 6 (0x6), region = 89 }
 0x2dd   :  { %423 = vsyncpa [#allocation3], 1 }
 0x2de   :  { %425 = vsyncpa [#allocation3 + $0x1], 1 }
 0x2df   :  { %426 = vsyncpa [#allocation6], 1 }
 0x2e0   :  { %427 = vsyncpa [#allocation4], 1 }
 0x2e1   :  { %429 = vsyncpa [#allocation4 + $0x1], 1 }

</bundles_post_ra>
